<compile_context>
chip_gen: v7x
topology: tpu7x:2x2x1
jax: 0.10.0
libtpu: 0.0.40
codegen_flags: <defaults>
</compile_context>

<pallas_src>
import math
import functools

import jax
import jax.numpy as jnp
from jax.experimental import pallas as pl
from jax.experimental.pallas import tpu as pltpu


# ------------------------------ small helpers --------------------------------
def _vmem_limit_bytes(headroom=16 * 1024 * 1024):
    """Generation-aware scoped-VMEM limit (capacity minus headroom)."""
    cap = 64 * 1024 * 1024
    try:
        info = pltpu.get_tpu_info()
        cap = int(getattr(info, "vmem_capacity_bytes", cap))
    except Exception:
        pass
    cap = min(cap, 128 * 1024 * 1024)
    return max(32 * 1024 * 1024, cap - headroom)


def _pick_tile(n, target):
    """Largest divisor of n that is <= target, preferring 128- then 8-aligned."""
    target = min(n, target)
    if target >= n:
        return n
    for align in (128, 8, 1):
        t = (target // align) * align
        while t >= align:
            if n % t == 0:
                return t
            t -= align
    return n


def _layernorm(x, g, b, eps):
    mu = jnp.mean(x, axis=-1, keepdims=True)
    xc = x - mu
    var = jnp.mean(xc * xc, axis=-1, keepdims=True)
    return xc * jax.lax.rsqrt(var + eps) * g + b


# --------------------------- kernel 1: LN1 + QKV -----------------------------
def _ln_qkv_kernel(x_ref, ln1_g_ref, ln1_b_ref, qkv_w_ref, qkv_b_ref, qkv_ref,
                   *, eps, compute_dtype):
    x = x_ref[...].astype(jnp.float32)
    h1 = _layernorm(x, ln1_g_ref[...], ln1_b_ref[...], eps).astype(compute_dtype)
    qkv = jnp.dot(h1, qkv_w_ref[...], preferred_element_type=jnp.float32)
    qkv_ref[...] = (qkv + qkv_b_ref[...]).astype(qkv_ref.dtype)


# ---------------------- kernel 2: flash causal attention ----------------------
def _flash_attn_kernel(qi_ref, ki_ref, q_ref, k_ref, v_ref, o_ref,
                       m_sc, l_sc, acc_sc, *, scale, tq, tk, approx_recip):
    j = pl.program_id(1)
    qi = qi_ref[j]                        # q-tile index of this step
    ki = ki_ref[j]                        # kv-tile index of this step
    last_ki = (qi * tq + tq - 1) // tk    # last kv tile at/below the diagonal

    @pl.when(ki == 0)
    def _init():
        m_sc[...] = jnp.full(m_sc.shape, -jnp.inf, m_sc.dtype)
        l_sc[...] = jnp.zeros(l_sc.shape, l_sc.dtype)
        acc_sc[...] = jnp.zeros(acc_sc.shape, acc_sc.dtype)

    # Fold the 1/sqrt(dh) scale into q once (tq*dh mults instead of tq*tk).
    q = q_ref[...] * scale
    k = k_ref[...]
    v = v_ref[...]

    def scores():
        # q @ k^T with f32 accumulation on the MXU.
        return jax.lax.dot_general(q, k, (((1,), (1,)), ((), ())),
                                   preferred_element_type=jnp.float32)

    def online_softmax_update(s):
        m_prev = m_sc[...]
        m_new = jnp.maximum(m_prev, jnp.max(s, axis=-1, keepdims=True))
        alpha = jnp.exp(m_prev - m_new)
        p = jnp.exp(s - m_new)
        l_sc[...] = alpha * l_sc[...] + jnp.sum(p, axis=-1, keepdims=True)
        acc_sc[...] = alpha * acc_sc[...] + jnp.dot(
            p.astype(v.dtype), v, preferred_element_type=jnp.float32)
        m_sc[...] = m_new

    # Only tiles straddling the diagonal need the iota/compare/select mask.
    needs_mask = (ki * tk + tk - 1) > (qi * tq)

    @pl.when(needs_mask)
    def _diagonal_tile():
        s = scores()
        row = jax.lax.broadcasted_iota(jnp.int32, (tq, tk), 0)
        col = jax.lax.broadcasted_iota(jnp.int32, (tq, tk), 1)
        s = jnp.where(row + (qi * tq - ki * tk) >= col, s, -1e30)
        online_softmax_update(s)

    @pl.when(jnp.logical_not(needs_mask))
    def _interior_tile():
        online_softmax_update(scores())

    @pl.when(ki == last_ki)
    def _finalize():
        inv_l = pl.reciprocal(l_sc[...], approx=approx_recip)
        o_ref[...] = (acc_sc[...] * inv_l).astype(o_ref.dtype)


# ------------- kernel 3: out-proj + residual + LN2 + MLP + residual ----------
def _out_mlp_kernel(ctx_ref, x_ref, out_w_ref, out_b_ref,
                    ln2_g_ref, ln2_b_ref,
                    up_w_ref, up_b_ref, down_w_ref, down_b_ref,
                    o_ref, *, eps, compute_dtype):
    x = x_ref[...].astype(jnp.float32)
    attn = jnp.dot(ctx_ref[...], out_w_ref[...],
                   preferred_element_type=jnp.float32) + out_b_ref[...]
    x1 = x + attn                                        # residual 1 (f32)
    h2 = _layernorm(x1, ln2_g_ref[...], ln2_b_ref[...], eps).astype(compute_dtype)
    up = jnp.dot(h2, up_w_ref[...], preferred_element_type=jnp.float32) + up_b_ref[...]
    act = jax.nn.gelu(up, approximate=True).astype(compute_dtype)
    mlp = jnp.dot(act, down_w_ref[...], preferred_element_type=jnp.float32) + down_b_ref[...]
    o_ref[...] = (x1 + mlp).astype(o_ref.dtype)          # residual 2 (f32)


# --------------------------------- wrapper -----------------------------------
def _block_impl(x, params, *, n_head, eps, compute_dtype, seq_tile, q_tile,
                kv_tile, approx_recip, single_buffer_weights):
    S, D = x.shape
    assert D % n_head == 0, "n_embd must be divisible by n_head"
    dh = D // n_head
    cdt = compute_dtype
    f32 = jnp.float32

    # Seq tiles for the projection/MLP kernels; cap at S//2 (when that still
    # leaves >=256 rows) so v7x's two TensorCores both get grid steps.
    ts_target = min(seq_tile, S)
    if S // 2 >= 256:
        ts_target = min(ts_target, S // 2)
    ts = _pick_tile(S, ts_target)
    tq = _pick_tile(S, min(q_tile, S))
    tk = _pick_tile(S, min(kv_tile, S))

    vmem_limit = _vmem_limit_bytes()

    def inv_spec(shape):
        """BlockSpec for a grid-invariant operand (weights / biases / LN)."""
        nd = len(shape)
        idx = lambda i, nd=nd: (0,) * nd
        if single_buffer_weights:
            return pl.BlockSpec(shape, idx, pipeline_mode=pl.Buffered(1))
        return pl.BlockSpec(shape, idx)

    # dtype plumbing: matmul weights in compute dtype, biases / LN params f32.
    qkv_w = params["qkv_w"].astype(cdt)
    out_w = params["out_w"].astype(cdt)
    up_w = params["up_w"].astype(cdt)
    down_w = params["down_w"].astype(cdt)
    ln1_g, ln1_b = params["ln1_g"].astype(f32), params["ln1_b"].astype(f32)
    ln2_g, ln2_b = params["ln2_g"].astype(f32), params["ln2_b"].astype(f32)
    qkv_b = params["qkv_b"].astype(f32)
    out_b = params["out_b"].astype(f32)
    up_b = params["up_b"].astype(f32)
    down_b = params["down_b"].astype(f32)

    # ---- 1) LN1 + fused QKV projection (tiled over seq) ----
    qkv = pl.pallas_call(
        functools.partial(_ln_qkv_kernel, eps=eps, compute_dtype=cdt),
        grid=(S // ts,),
        in_specs=[
            pl.BlockSpec((ts, D), lambda i: (i, 0)),
            inv_spec((1, D)), inv_spec((1, D)),
            inv_spec((D, 3 * D)), inv_spec((1, 3 * D)),
        ],
        out_specs=pl.BlockSpec((ts, 3 * D), lambda i: (i, 0)),
        out_shape=jax.ShapeDtypeStruct((S, 3 * D), cdt),
        compiler_params=pltpu.CompilerParams(
            dimension_semantics=("parallel",), vmem_limit_bytes=vmem_limit),
    )(x, ln1_g, ln1_b, qkv_w, qkv_b)

    # ---- 2) flash-style causal attention ----
    # Enumerate only (q-tile, kv-tile) pairs at/below the causal diagonal and
    # drive the grid through scalar-prefetched tile-id tables.
    n_q, n_k = S // tq, S // tk
    pairs = [(qi, ki) for qi in range(n_q) for ki in range(n_k)
             if ki * tk <= qi * tq + tq - 1]
    qi_map = jnp.asarray([p[0] for p in pairs], jnp.int32)
    ki_map = jnp.asarray([p[1] for p in pairs], jnp.int32)
    n_pairs = len(pairs)

    heads_packed = (dh % 128 == 0)
    if heads_packed:
        # Read Q/K/V straight out of [S, 3D] as dh-wide column blocks
        # (Q head h -> col-block h, K -> n_head+h, V -> 2*n_head+h) and write
        # the context as [S, D] column blocks: no wrapper transposes.
        attn_inputs = (qkv, qkv, qkv)
        attn_in_specs = [
            pl.BlockSpec((tq, dh), lambda h, j, qi, ki: (qi[j], h)),
            pl.BlockSpec((tk, dh), lambda h, j, qi, ki: (ki[j], n_head + h)),
            pl.BlockSpec((tk, dh), lambda h, j, qi, ki: (ki[j], 2 * n_head + h)),
        ]
        attn_out_spec = pl.BlockSpec((tq, dh), lambda h, j, qi, ki: (qi[j], h))
        attn_out_shape = jax.ShapeDtypeStruct((S, D), cdt)
    else:
        # dh-wide column blocks would violate the 128-lane rule; fall back to
        # a wrapper-side head split into [n_head, S, dh].
        q3, k3, v3 = jnp.split(qkv, 3, axis=-1)
        to_heads = lambda t: t.reshape(S, n_head, dh).transpose(1, 0, 2)
        attn_inputs = (to_heads(q3), to_heads(k3), to_heads(v3))
        attn_in_specs = [
            pl.BlockSpec((None, tq, dh), lambda h, j, qi, ki: (h, qi[j], 0)),
            pl.BlockSpec((None, tk, dh), lambda h, j, qi, ki: (h, ki[j], 0)),
            pl.BlockSpec((None, tk, dh), lambda h, j, qi, ki: (h, ki[j], 0)),
        ]
        attn_out_spec = pl.BlockSpec((None, tq, dh),
                                     lambda h, j, qi, ki: (h, qi[j], 0))
        attn_out_shape = jax.ShapeDtypeStruct((n_head, S, dh), cdt)

    ctx = pl.pallas_call(
        functools.partial(_flash_attn_kernel, scale=1.0 / math.sqrt(dh),
                          tq=tq, tk=tk, approx_recip=approx_recip),
        grid_spec=pltpu.PrefetchScalarGridSpec(
            num_scalar_prefetch=2,
            grid=(n_head, n_pairs),
            in_specs=attn_in_specs,
            out_specs=attn_out_spec,
            scratch_shapes=[
                pltpu.VMEM((tq, 1), jnp.float32),    # running max
                pltpu.VMEM((tq, 1), jnp.float32),    # running denominator
                pltpu.VMEM((tq, dh), jnp.float32),   # output accumulator
            ]),
        out_shape=attn_out_shape,
        compiler_params=pltpu.CompilerParams(
            dimension_semantics=("parallel", "arbitrary"),
            vmem_limit_bytes=vmem_limit),
    )(qi_map, ki_map, *attn_inputs)

    if not heads_packed:
        ctx = ctx.transpose(1, 0, 2).reshape(S, D)   # merge heads -> [S, D]

    # ---- 3) out-proj + residual + LN2 + MLP + residual (tiled over seq) ----
    out = pl.pallas_call(
        functools.partial(_out_mlp_kernel, eps=eps, compute_dtype=cdt),
        grid=(S // ts,),
        in_specs=[
            pl.BlockSpec((ts, D), lambda i: (i, 0)),   # attention context
            pl.BlockSpec((ts, D), lambda i: (i, 0)),   # residual input x
            inv_spec((D, D)), inv_spec((1, D)),
            inv_spec((1, D)), inv_spec((1, D)),
            inv_spec((D, 4 * D)), inv_spec((1, 4 * D)),
            inv_spec((4 * D, D)), inv_spec((1, D)),
        ],
        out_specs=pl.BlockSpec((ts, D), lambda i: (i, 0)),
        out_shape=jax.ShapeDtypeStruct((S, D), x.dtype),
        compiler_params=pltpu.CompilerParams(
            dimension_semantics=("parallel",), vmem_limit_bytes=vmem_limit),
    )(ctx, x, out_w, out_b, ln2_g, ln2_b, up_w, up_b, down_w, down_b)

    return out


def gpt2_block(x, params, *, n_head, eps=1e-5, compute_dtype=jnp.bfloat16,
               seq_tile=512, q_tile=512, kv_tile=512, approx_recip=True,
               single_buffer_weights=True):
    kwargs = dict(n_head=n_head, eps=eps, compute_dtype=compute_dtype,
                  seq_tile=seq_tile, q_tile=q_tile, kv_tile=kv_tile,
                  approx_recip=approx_recip)
    if single_buffer_weights:
        try:
            return _block_impl(x, params, single_buffer_weights=True, **kwargs)
        except Exception:
            # pipeline_mode=pl.Buffered(1) unsupported on this jax/libtpu:
            # fall back to default (double-buffered) weight residency.
            pass
    return _block_impl(x, params, single_buffer_weights=False, **kwargs)


# ------------------------------ pure-JAX reference ---------------------------
def _reference(x, p, *, n_head, eps=1e-5):
    def ln(h, g, b):
        mu = jnp.mean(h, -1, keepdims=True)
        var = jnp.mean((h - mu) ** 2, -1, keepdims=True)
        return (h - mu) * jax.lax.rsqrt(var + eps) * g + b

    S, D = x.shape
    dh = D // n_head
    h1 = ln(x, p["ln1_g"], p["ln1_b"])
    qkv = h1 @ p["qkv_w"] + p["qkv_b"]
    mask = jnp.tril(jnp.ones((S, S), bool))
    outs = []
    for h in range(n_head):
        q = qkv[:, h * dh:(h + 1) * dh]
        k = qkv[:, D + h * dh:D + (h + 1) * dh]
        v = qkv[:, 2 * D + h * dh:2 * D + (h + 1) * dh]
        s = (q @ k.T) / math.sqrt(dh)
        s = jnp.where(mask, s, -1e30)
        outs.append(jax.nn.softmax(s, -1) @ v)
    attn = jnp.concatenate(outs, -1) @ p["out_w"] + p["out_b"]
    x = x + attn
    h2 = ln(x, p["ln2_g"], p["ln2_b"])
    mlp = jax.nn.gelu(h2 @ p["up_w"] + p["up_b"], approximate=True) @ p["down_w"] + p["down_b"]
    return x + mlp


def make_params(key, n_embd):
    ks = jax.random.split(key, 8)
    s = 0.02
    D = n_embd
    return {
        "ln1_g": jnp.ones((1, D), jnp.float32),
        "ln1_b": jnp.zeros((1, D), jnp.float32),
        "qkv_w": s * jax.random.normal(ks[0], (D, 3 * D), jnp.float32),
        "qkv_b": s * jax.random.normal(ks[1], (1, 3 * D), jnp.float32),
        "out_w": s * jax.random.normal(ks[2], (D, D), jnp.float32),
        "out_b": s * jax.random.normal(ks[3], (1, D), jnp.float32),
        "ln2_g": jnp.ones((1, D), jnp.float32),
        "ln2_b": jnp.zeros((1, D), jnp.float32),
        "up_w": s * jax.random.normal(ks[4], (D, 4 * D), jnp.float32),
        "up_b": s * jax.random.normal(ks[5], (1, 4 * D), jnp.float32),
        "down_w": s * jax.random.normal(ks[6], (4 * D, D), jnp.float32),
        "down_b": s * jax.random.normal(ks[7], (1, D), jnp.float32),
    }


if __name__ == "__main__":
    SEQ, N_EMBD, N_HEAD = 8, 32, 4

    key = jax.random.PRNGKey(0)
    kx, kp = jax.random.split(key)
    x = jax.random.normal(kx, (SEQ, N_EMBD), jnp.float32)
    params = make_params(kp, N_EMBD)

    ref = _reference(x, params, n_head=N_HEAD)

    # f32 compute path with exact softmax reciprocal: tight structural check.
    out_f32 = jax.block_until_ready(
        gpt2_block(x, params, n_head=N_HEAD, compute_dtype=jnp.float32,
                   approx_recip=False))
    assert out_f32.shape == (SEQ, N_EMBD)
    err_f32 = float(jnp.max(jnp.abs(out_f32 - ref)))
    assert err_f32 < 2e-3, err_f32

    # Default bf16 compute path (bf16 matmuls, f32 accumulation, approx recip).
    out_bf16 = jax.block_until_ready(gpt2_block(x, params, n_head=N_HEAD))
    assert out_bf16.shape == (SEQ, N_EMBD)
    err_bf16 = float(jnp.max(jnp.abs(out_bf16.astype(jnp.float32) - ref)))
    assert err_bf16 < 5e-2, err_bf16

    print("KERNEL_OK")
</pallas_src>

<mosaic_0001>
module attributes {stable_mosaic.version = 11 : i64} {
  func.func @_ln_qkv_kernel(%arg0: i32, %arg1: memref<8x32xf32, #tpu.memory_space<vmem>>, %arg2: memref<1x32xf32, #tpu.memory_space<vmem>>, %arg3: memref<1x32xf32, #tpu.memory_space<vmem>>, %arg4: memref<32x96xf32, #tpu.memory_space<vmem>>, %arg5: memref<1x96xf32, #tpu.memory_space<vmem>>, %arg6: memref<8x96xf32, #tpu.memory_space<vmem>>) attributes {dimension_semantics = [#tpu.dimension_semantics<parallel>], iteration_bounds = array<i64: 1>, scalar_prefetch = 0 : i64, scratch_operands = 0 : i64, tpu.core_type = #tpu.core_type<tc>, window_params = [{transform_indices = @transform_0, window_bounds = array<i64: 8, 32>}, {pipeline_mode = #tpu.pipeline_mode<synchronous>, transform_indices = @transform_1, window_bounds = array<i64: 1, 32>}, {pipeline_mode = #tpu.pipeline_mode<synchronous>, transform_indices = @transform_2, window_bounds = array<i64: 1, 32>}, {pipeline_mode = #tpu.pipeline_mode<synchronous>, transform_indices = @transform_3, window_bounds = array<i64: 32, 96>}, {pipeline_mode = #tpu.pipeline_mode<synchronous>, transform_indices = @transform_4, window_bounds = array<i64: 1, 96>}, {transform_indices = @transform_5, window_bounds = array<i64: 8, 96>}]} {
    %c0 = arith.constant 0 : index
    %c0_0 = arith.constant 0 : index
    %0 = vector.load %arg1[%c0, %c0_0] : memref<8x32xf32, #tpu.memory_space<vmem>>, vector<8x32xf32>
    %c0_1 = arith.constant 0 : index
    %c0_2 = arith.constant 0 : index
    %1 = vector.load %arg2[%c0_1, %c0_2] : memref<1x32xf32, #tpu.memory_space<vmem>>, vector<1x32xf32>
    %c0_3 = arith.constant 0 : index
    %c0_4 = arith.constant 0 : index
    %2 = vector.load %arg3[%c0_3, %c0_4] : memref<1x32xf32, #tpu.memory_space<vmem>>, vector<1x32xf32>
    %cst = arith.constant dense<0.000000e+00> : vector<8xf32>
    %3 = vector.multi_reduction <add>, %0, %cst [1] : vector<8x32xf32> to vector<8xf32>
    %4 = vector.shape_cast %3 : vector<8xf32> to vector<8x1xf32>
    %cst_5 = arith.constant 3.200000e+01 : f32
    %5 = vector.broadcast %cst_5 : f32 to vector<8x1xf32>
    %6 = arith.divf %4, %5 : vector<8x1xf32>
    %7 = vector.broadcast %6 : vector<8x1xf32> to vector<8x32xf32>
    %8 = arith.subf %0, %7 : vector<8x32xf32>
    %9 = arith.mulf %8, %8 : vector<8x32xf32>
    %cst_6 = arith.constant dense<0.000000e+00> : vector<8xf32>
    %10 = vector.multi_reduction <add>, %9, %cst_6 [1] : vector<8x32xf32> to vector<8xf32>
    %11 = vector.shape_cast %10 : vector<8xf32> to vector<8x1xf32>
    %cst_7 = arith.constant 3.200000e+01 : f32
    %12 = vector.broadcast %cst_7 : f32 to vector<8x1xf32>
    %13 = arith.divf %11, %12 : vector<8x1xf32>
    %cst_8 = arith.constant 9.99999974E-6 : f32
    %14 = vector.broadcast %cst_8 : f32 to vector<8x1xf32>
    %15 = arith.addf %13, %14 : vector<8x1xf32>
    %16 = math.rsqrt %15 : vector<8x1xf32>
    %17 = vector.broadcast %16 : vector<8x1xf32> to vector<8x32xf32>
    %18 = arith.mulf %8, %17 : vector<8x32xf32>
    %19 = vector.broadcast %1 : vector<1x32xf32> to vector<8x32xf32>
    %20 = arith.mulf %18, %19 : vector<8x32xf32>
    %21 = vector.broadcast %2 : vector<1x32xf32> to vector<8x32xf32>
    %22 = arith.addf %20, %21 : vector<8x32xf32>
    %c0_9 = arith.constant 0 : index
    %c0_10 = arith.constant 0 : index
    %23 = vector.load %arg4[%c0_9, %c0_10] : memref<32x96xf32, #tpu.memory_space<vmem>>, vector<32x96xf32>
    %cst_11 = arith.constant dense<0.000000e+00> : vector<8x96xf32>
    %24 = tpu.matmul %22, %23, %cst_11 {dimension_numbers = #tpu.dot_dimension_numbers<[1], [0], [0], [1], [0, 0, 1, 1], [], []>} : vector<8x32xf32>, vector<32x96xf32>, vector<8x96xf32> -> vector<8x96xf32>
    %c0_12 = arith.constant 0 : index
    %c0_13 = arith.constant 0 : index
    %25 = vector.load %arg5[%c0_12, %c0_13] : memref<1x96xf32, #tpu.memory_space<vmem>>, vector<1x96xf32>
    %26 = vector.broadcast %25 : vector<1x96xf32> to vector<8x96xf32>
    %27 = arith.addf %24, %26 : vector<8x96xf32>
    %c0_14 = arith.constant 0 : index
    %c0_15 = arith.constant 0 : index
    %28 = vector.load %arg6[%c0_14, %c0_15] : memref<8x96xf32, #tpu.memory_space<vmem>>, vector<8x96xf32>
    tpu.vector_store %arg6[%c0_14, %c0_15], %27 {strides = array<i32>} : memref<8x96xf32, #tpu.memory_space<vmem>>, vector<8x96xf32>,
    return
  }
  func.func @transform_0(%arg0: i32) -> (i32, i32) {
    %c0_i32 = arith.constant 0 : i32
    %c0_i32_0 = arith.constant 0 : i32
    return %arg0, %c0_i32 : i32, i32
  }
  func.func @transform_1(%arg0: i32) -> (i32, i32) {
    %c0_i32 = arith.constant 0 : i32
    %c0_i32_0 = arith.constant 0 : i32
    %c0_i32_1 = arith.constant 0 : i32
    return %c0_i32, %c0_i32_0 : i32, i32
  }
  func.func @transform_2(%arg0: i32) -> (i32, i32) {
    %c0_i32 = arith.constant 0 : i32
    %c0_i32_0 = arith.constant 0 : i32
    %c0_i32_1 = arith.constant 0 : i32
    return %c0_i32, %c0_i32_0 : i32, i32
  }
  func.func @transform_3(%arg0: i32) -> (i32, i32) {
    %c0_i32 = arith.constant 0 : i32
    %c0_i32_0 = arith.constant 0 : i32
    %c0_i32_1 = arith.constant 0 : i32
    return %c0_i32, %c0_i32_0 : i32, i32
  }
  func.func @transform_4(%arg0: i32) -> (i32, i32) {
    %c0_i32 = arith.constant 0 : i32
    %c0_i32_0 = arith.constant 0 : i32
    %c0_i32_1 = arith.constant 0 : i32
    return %c0_i32, %c0_i32_0 : i32, i32
  }
  func.func @transform_5(%arg0: i32) -> (i32, i32) {
    %c0_i32 = arith.constant 0 : i32
    %c0_i32_0 = arith.constant 0 : i32
    return %arg0, %c0_i32 : i32, i32
  }
}

module attributes {stable_mosaic.version = 11 : i64} {
  func.func @_ln_qkv_kernel(%arg0: i32, %arg1: memref<8x32xf32, #tpu.memory_space<vmem>>, %arg2: memref<1x32xf32, #tpu.memory_space<vmem>>, %arg3: memref<1x32xf32, #tpu.memory_space<vmem>>, %arg4: memref<32x96xf32, #tpu.memory_space<vmem>>, %arg5: memref<1x96xf32, #tpu.memory_space<vmem>>, %arg6: memref<8x96xf32, #tpu.memory_space<vmem>>) attributes {dimension_semantics = [#tpu.dimension_semantics<parallel>], iteration_bounds = array<i64: 1>, scalar_prefetch = 0 : i64, scratch_operands = 0 : i64, tpu.core_type = #tpu.core_type<tc>, window_params = [{transform_indices = @transform_0, window_bounds = array<i64: 8, 32>}, {pipeline_mode = #tpu.pipeline_mode<synchronous>, transform_indices = @transform_1, window_bounds = array<i64: 1, 32>}, {pipeline_mode = #tpu.pipeline_mode<synchronous>, transform_indices = @transform_2, window_bounds = array<i64: 1, 32>}, {pipeline_mode = #tpu.pipeline_mode<synchronous>, transform_indices = @transform_3, window_bounds = array<i64: 32, 96>}, {pipeline_mode = #tpu.pipeline_mode<synchronous>, transform_indices = @transform_4, window_bounds = array<i64: 1, 96>}, {transform_indices = @transform_5, window_bounds = array<i64: 8, 96>}]} {
    %c0 = arith.constant 0 : index
    %c0_0 = arith.constant 0 : index
    %0 = vector.load %arg1[%c0, %c0_0] : memref<8x32xf32, #tpu.memory_space<vmem>>, vector<8x32xf32>
    %c0_1 = arith.constant 0 : index
    %c0_2 = arith.constant 0 : index
    %1 = vector.load %arg2[%c0_1, %c0_2] : memref<1x32xf32, #tpu.memory_space<vmem>>, vector<1x32xf32>
    %c0_3 = arith.constant 0 : index
    %c0_4 = arith.constant 0 : index
    %2 = vector.load %arg3[%c0_3, %c0_4] : memref<1x32xf32, #tpu.memory_space<vmem>>, vector<1x32xf32>
    %cst = arith.constant dense<0.000000e+00> : vector<8xf32>
    %3 = vector.multi_reduction <add>, %0, %cst [1] : vector<8x32xf32> to vector<8xf32>
    %4 = vector.shape_cast %3 : vector<8xf32> to vector<8x1xf32>
    %cst_5 = arith.constant 3.200000e+01 : f32
    %5 = vector.broadcast %cst_5 : f32 to vector<8x1xf32>
    %6 = arith.divf %4, %5 : vector<8x1xf32>
    %7 = vector.broadcast %6 : vector<8x1xf32> to vector<8x32xf32>
    %8 = arith.subf %0, %7 : vector<8x32xf32>
    %9 = arith.mulf %8, %8 : vector<8x32xf32>
    %cst_6 = arith.constant dense<0.000000e+00> : vector<8xf32>
    %10 = vector.multi_reduction <add>, %9, %cst_6 [1] : vector<8x32xf32> to vector<8xf32>
    %11 = vector.shape_cast %10 : vector<8xf32> to vector<8x1xf32>
    %cst_7 = arith.constant 3.200000e+01 : f32
    %12 = vector.broadcast %cst_7 : f32 to vector<8x1xf32>
    %13 = arith.divf %11, %12 : vector<8x1xf32>
    %cst_8 = arith.constant 9.99999974E-6 : f32
    %14 = vector.broadcast %cst_8 : f32 to vector<8x1xf32>
    %15 = arith.addf %13, %14 : vector<8x1xf32>
    %16 = math.rsqrt %15 : vector<8x1xf32>
    %17 = vector.broadcast %16 : vector<8x1xf32> to vector<8x32xf32>
    %18 = arith.mulf %8, %17 : vector<8x32xf32>
    %19 = vector.broadcast %1 : vector<1x32xf32> to vector<8x32xf32>
    %20 = arith.mulf %18, %19 : vector<8x32xf32>
    %21 = vector.broadcast %2 : vector<1x32xf32> to vector<8x32xf32>
    %22 = arith.addf %20, %21 : vector<8x32xf32>
    %c0_9 = arith.constant 0 : index
    %c0_10 = arith.constant 0 : index
    %23 = vector.load %arg4[%c0_9, %c0_10] : memref<32x96xf32, #tpu.memory_space<vmem>>, vector<32x96xf32>
    %cst_11 = arith.constant dense<0.000000e+00> : vector<8x96xf32>
    %24 = tpu.matmul %22, %23, %cst_11 {dimension_numbers = #tpu.dot_dimension_numbers<[1], [0], [0], [1], [0, 0, 1, 1], [], []>} : vector<8x32xf32>, vector<32x96xf32>, vector<8x96xf32> -> vector<8x96xf32>
    %c0_12 = arith.constant 0 : index
    %c0_13 = arith.constant 0 : index
    %25 = vector.load %arg5[%c0_12, %c0_13] : memref<1x96xf32, #tpu.memory_space<vmem>>, vector<1x96xf32>
    %26 = vector.broadcast %25 : vector<1x96xf32> to vector<8x96xf32>
    %27 = arith.addf %24, %26 : vector<8x96xf32>
    %c0_14 = arith.constant 0 : index
    %c0_15 = arith.constant 0 : index
    %28 = vector.load %arg6[%c0_14, %c0_15] : memref<8x96xf32, #tpu.memory_space<vmem>>, vector<8x96xf32>
    tpu.vector_store %arg6[%c0_14, %c0_15], %27 {strides = array<i32>} : memref<8x96xf32, #tpu.memory_space<vmem>>, vector<8x96xf32>,
    return
  }
  func.func @transform_0(%arg0: i32) -> (i32, i32) {
    %c0_i32 = arith.constant 0 : i32
    %c0_i32_0 = arith.constant 0 : i32
    return %arg0, %c0_i32 : i32, i32
  }
  func.func @transform_1(%arg0: i32) -> (i32, i32) {
    %c0_i32 = arith.constant 0 : i32
    %c0_i32_0 = arith.constant 0 : i32
    %c0_i32_1 = arith.constant 0 : i32
    return %c0_i32, %c0_i32_0 : i32, i32
  }
  func.func @transform_2(%arg0: i32) -> (i32, i32) {
    %c0_i32 = arith.constant 0 : i32
    %c0_i32_0 = arith.constant 0 : i32
    %c0_i32_1 = arith.constant 0 : i32
    return %c0_i32, %c0_i32_0 : i32, i32
  }
  func.func @transform_3(%arg0: i32) -> (i32, i32) {
    %c0_i32 = arith.constant 0 : i32
    %c0_i32_0 = arith.constant 0 : i32
    %c0_i32_1 = arith.constant 0 : i32
    return %c0_i32, %c0_i32_0 : i32, i32
  }
  func.func @transform_4(%arg0: i32) -> (i32, i32) {
    %c0_i32 = arith.constant 0 : i32
    %c0_i32_0 = arith.constant 0 : i32
    %c0_i32_1 = arith.constant 0 : i32
    return %c0_i32, %c0_i32_0 : i32, i32
  }
  func.func @transform_5(%arg0: i32) -> (i32, i32) {
    %c0_i32 = arith.constant 0 : i32
    %c0_i32_0 = arith.constant 0 : i32
    return %arg0, %c0_i32 : i32, i32
  }
}

</mosaic_0001>

<bundles_post_ra>
// kernel: tpu_custom_call.1
= control target key start
LH: loop header
LB: loop body
LE: loop exit
PB: predicated region body
PF: predicated region fallthrough
CT: control target
= control target key end

     0   :  { %10 = vsyncpa [#allocation3], 0  ;;  %s382_s0 = inlined_call_operand.hbm [shape: f32[8,32], index: 0, kind: input, shape index: {}]   ;;  %s383_s1 = inlined_call_operand.vmem [shape: f32[1,32], index: 1, kind: input, shape index: {}]   ;;  %s384_s2 = inlined_call_operand.vmem [shape: f32[1,32], index: 2, kind: input, shape index: {}]   ;;  %s385_s3 = inlined_call_operand.hbm [shape: f32[32,96], index: 3, kind: input, shape index: {}]   ;;  %s386_s4 = inlined_call_operand.vmem [shape: f32[1,96], index: 4, kind: input, shape index: {}]   ;;  %s387_s5 = inlined_call_operand.hbm [shape: f32[8,96], index: 5, kind: output, shape index: {}]  }
   0x1   :  { %11 = vsyncpa [#allocation6], 0 }
   0x2   :  { %12 = vsyncpa [#allocation4], 0  ;;  %s289_s18 = smov [#allocation2]   ;;  %s290_s20 = smov [#allocation5]  }
   0x3   :  { %s19_s19 = sshll.u32 %s289_s18, 4  ;;  %s32_s21 = sshll.u32 %s290_s20, 4  ;;  %s20_s19 = int_to_ptr.vmem [resolvable:$true] %s19_s19  ;;  %s327_s21 = int_to_ptr.vmem [resolvable:$true] %s32_s21 }
   0x4   :  { %s217_s24 = scalar_lea.hbm %s382_s0, 128 }
   0x5   :  { %p218_p0 = scmp.ne.s32.totalorder %s382_s0, %s217_s24  ;;  %p221_p1 = scmp.lt.u32.totalorder %s217_s24, %s382_s0 }
   0x7   :  { %p223_p2 = pnand %p221_p1, %p218_p0 }
   0x9   :  { %226 = shalt.err (!%p223_p2)
}
   0xa   :  { %s227_s29 = scalar_lea.vmem %s20_s19, 128  ;;  %p232_p4 = scmp.lt.s32.totalorder %s20_s19, %s20_s19 }
   0xb   :  { %p228_p3 = scmp.ne.s32.totalorder %s20_s19, %s227_s29  ;;  %p233_p5 = scmp.lt.s32.totalorder %s227_s29, %s227_s29 }
   0xd   :  { %p234_p6 = por %p233_p5, %p232_p4 }
   0xf   :  { %p235_p7 = pnand %p234_p6, %p228_p3 }
  0x11   :  { %238 = shalt.err (!%p235_p7)
}
  0x12   :  { %22 = dma.hbm_to_vmem [thread:$0]  %s382_s0, 128, %s20_s19, [#allocation3]  }
  0x13   :  { %s239_s9 = scalar_lea.hbm %s385_s3, 512 }
  0x14   :  { %p240_p8 = scmp.ne.s32.totalorder %s385_s3, %s239_s9  ;;  %p243_p9 = scmp.lt.u32.totalorder %s239_s9, %s385_s3 }
  0x16   :  { %p245_p10 = pnand %p243_p9, %p240_p8 }
  0x18   :  { %248 = shalt.err (!%p245_p10)
}
  0x19   :  { %s249_s14 = scalar_lea.vmem %s327_s21, 512  ;;  %p254_p12 = scmp.lt.s32.totalorder %s327_s21, %s327_s21 }
  0x1a   :  { %p250_p11 = scmp.ne.s32.totalorder %s327_s21, %s249_s14  ;;  %p255_p13 = scmp.lt.s32.totalorder %s249_s14, %s249_s14 }
  0x1c   :  { %p256_p0 = por %p255_p13, %p254_p12 }
  0x1e   :  { %p257_p1 = pnand %p256_p0, %p250_p11 }
  0x20   :  { %260 = shalt.err (!%p257_p1)
}
  0x21   :  { %s291_s0 = smov 128   ;;  %s292_s15 = smov 8  }
  0x22   :  { %38 = dma.hbm_to_vmem [thread:$0]  %s385_s3, 512, %s327_s21, [#allocation6], %s291_s0, %s291_s0, %s292_s15  }
  0x23   :  { %283 = dma.done.wait [#allocation3], 128  }
  0x24   :  { %284 = vsyncadd [#allocation3], 4294967168 }
  0x25   :  { %285 = dma.done.wait [#allocation6], 512  }
  0x26   :  { %286 = vsyncadd [#allocation6], 4294966784  ;;  %vm50_vm0 = vcmask 261120   ;;  %v47_v0 = vld [vmem:[#allocation2] sm:$0xff]  ;;  %v79_v7 = vld [vmem:[#allocation5] sm:$0xff]  ;;  %v293_v10 = vmov 0.0|0.0  }
  0x27   :  { %v51_v1 = vsel %vm50_vm0, %v47_v0, 0.0  ;;  %v80_v8 = vld [vmem:[#allocation5 + $0x8] sm:$0xff]  ;;  %v81_v9 = vld [vmem:[#allocation5 + $0x10] sm:$0xff]  ;;  %201 = vmatprep.subr.bf16.mxu0 %v293_v10  ;;  %v82_v12 = vld [vmem:[#allocation5 + $0x18] sm:$0xff]  ;;  %vm294_vm1 = vmmov 0   ;;  %v295_v13 = vmov 0.0  }
  0x28   :  { %52 = vadd.xlane.f32.xlu0 %v51_v1  ;;  %v202_v11 = vpack.c.bf16 %v80_v8, %v79_v7  ;;  %198 = vmatprep.mubr.msk.f32.mxu0 %vm294_vm1, %v295_v13  ;;  %v205_v14 = vpack.c.bf16 %v82_v12, %v81_v9  ;;  %v181_v19 = vld [vmem:[%s383_s1] ss:$0 sm:$0xff]  ;;  %s296_s23 = smov [#allocation7]   ;;  %vm163_vm2 = vcmask 785408  }
  0x29   :  { %v182_v21 = vld [vmem:[%s384_s2] ss:$0 sm:$0xff]  ;;  %s171_s24 = sshll.u32 %s296_s23, 4  ;;  %s172_s24 = int_to_ptr.vmem [resolvable:$true] %s171_s24 }
  0x2a   :  { %203 = vmatpush3.bf16.msra.mxu0 %v202_v11  ;;  %v183_v24 = vld [vmem:[%s386_s4] ss:$0 sm:$0xff]  ;;  %s261_s1 = scalar_lea.vmem %s172_s24, 128  ;;  %p266_p3 = scmp.lt.s32.totalorder %s172_s24, %s172_s24 }
  0x2b   :  { %204 = vmatprep.subr.bf16.mxu0 %v293_v10  ;;  %p262_p2 = scmp.ne.s32.totalorder %s172_s24, %s261_s1  ;;  %p267_p4 = scmp.lt.s32.totalorder %s261_s1, %s261_s1 }
  0x2d   :  { %p268_p5 = por %p267_p4, %p266_p3 }
  0x2e   :  { %206 = vmatpush3.bf16.msra.mxu0 %v205_v14 }
  0x2f   :  { %p269_p6 = pnand %p268_p5, %p262_p2 }
  0xb5   :  { %v53_v2 = vpop.xlane.xlu0 %52 }
  0xb6   :  { %v55_v3 = vmul.f32 0.03125, %v53_v2 }
  0xb8   :  { %v56_v4 = vsub.f32 %v47_v0, %v55_v3 }
  0xba   :  { %v57_v5 = vmul.f32 %v56_v4, %v56_v4 }
  0xbc   :  { %v58_v6 = vsel %vm50_vm0, %v57_v5, 0.0 }
  0xbd   :  { %59 = vadd.xlane.f32.xlu0 %v58_v6 }
 0x14a   :  { %v60_v15 = vpop.xlane.xlu0 %59 }
 0x14b   :  { %v61_v16 = vmul.f32 0.03125, %v60_v15 }
 0x14d   :  { %v62_v17 = vadd.f32 1e-05, %v61_v16 }
 0x14f   :  { %215 = vrsqrt.f32 %v62_v17 }
 0x159   :  { %v216_v18 = vpop.eup %215 }
 0x15a   :  { %v64_v20 = vmul.f32 %v216_v18, %v56_v4 }
 0x15c   :  { %v71_v22 = vmul.f32 %v181_v19, %v64_v20 }
 0x15e   :  { %v78_v23 = vadd.f32 %v182_v21, %v71_v22 }
 0x160   :  { %199 = vmatmul.mubr.msk.f32.vlgmr.msra.gmra.mrb[0].mxu0 %vm50_vm0, %v78_v23 }
 0x233   :  { %v159_v25 = vpop.f32.mrb[0].mxu0 }
 0x234   :  { %v160_v26 = vadd.f32 %v183_v24, %v159_v25  ;;  %v200_v27 = vpop.f32.mrb[1].mxu0 }
 0x236   :  { %164 = vst.msk [vmem:[#allocation7] sm:$0xff] %vm163_vm2, %v160_v26 }
 0x237   :  { %272 = shalt.err (!%p269_p6)
}
 0x238   :  { %s273_s26 = scalar_lea.hbm %s387_s5, 128 }
 0x239   :  { %p274_p7 = scmp.ne.s32.totalorder %s387_s5, %s273_s26  ;;  %p277_p8 = scmp.lt.u32.totalorder %s273_s26, %s387_s5 }
 0x23b   :  { %p279_p9 = pnand %p277_p8, %p274_p7 }
 0x23d   :  { %282 = shalt.err (!%p279_p9)
}
 0x23e   :  { %174 = dma.vmem_to_hbm [thread:$0]  %s172_s24, 128, %s387_s5, [#allocation4]  }
 0x23f   :  { %287 = dma.done.wait [#allocation4], 128  }
 0x240   :  { %288 = vsyncadd [#allocation4], 4294967168 }
 0x241   :  { %178 = vsyncpa [#allocation3], 1 }
 0x242   :  { %179 = vsyncpa [#allocation6], 1 }
 0x243   :  { %180 = vsyncpa [#allocation4], 1 }

// kernel: tpu_custom_call.1
= control target key start
LH: loop header
LB: loop body
LE: loop exit
PB: predicated region body
PF: predicated region fallthrough
CT: control target
= control target key end

     0   :  { %10 = vsyncpa [#allocation3], 0  ;;  %s382_s0 = inlined_call_operand.hbm [shape: f32[8,32], index: 0, kind: input, shape index: {}]   ;;  %s383_s1 = inlined_call_operand.vmem [shape: f32[1,32], index: 1, kind: input, shape index: {}]   ;;  %s384_s2 = inlined_call_operand.vmem [shape: f32[1,32], index: 2, kind: input, shape index: {}]   ;;  %s385_s3 = inlined_call_operand.hbm [shape: f32[32,96], index: 3, kind: input, shape index: {}]   ;;  %s386_s4 = inlined_call_operand.vmem [shape: f32[1,96], index: 4, kind: input, shape index: {}]   ;;  %s387_s5 = inlined_call_operand.hbm [shape: f32[8,96], index: 5, kind: output, shape index: {}]  }
   0x1   :  { %11 = vsyncpa [#allocation6], 0 }
   0x2   :  { %12 = vsyncpa [#allocation4], 0  ;;  %s289_s18 = smov [#allocation2]   ;;  %s290_s20 = smov [#allocation5]  }
   0x3   :  { %s19_s19 = sshll.u32 %s289_s18, 4  ;;  %s32_s21 = sshll.u32 %s290_s20, 4  ;;  %s20_s19 = int_to_ptr.vmem [resolvable:$true] %s19_s19  ;;  %s327_s21 = int_to_ptr.vmem [resolvable:$true] %s32_s21 }
   0x4   :  { %s217_s24 = scalar_lea.hbm %s382_s0, 128 }
   0x5   :  { %p218_p0 = scmp.ne.s32.totalorder %s382_s0, %s217_s24  ;;  %p221_p1 = scmp.lt.u32.totalorder %s217_s24, %s382_s0 }
   0x7   :  { %p223_p2 = pnand %p221_p1, %p218_p0 }
   0x9   :  { %226 = shalt.err (!%p223_p2)
}
   0xa   :  { %s227_s29 = scalar_lea.vmem %s20_s19, 128  ;;  %p232_p4 = scmp.lt.s32.totalorder %s20_s19, %s20_s19 }
   0xb   :  { %p228_p3 = scmp.ne.s32.totalorder %s20_s19, %s227_s29  ;;  %p233_p5 = scmp.lt.s32.totalorder %s227_s29, %s227_s29 }
   0xd   :  { %p234_p6 = por %p233_p5, %p232_p4 }
   0xf   :  { %p235_p7 = pnand %p234_p6, %p228_p3 }
  0x11   :  { %238 = shalt.err (!%p235_p7)
}
  0x12   :  { %22 = dma.hbm_to_vmem [thread:$0]  %s382_s0, 128, %s20_s19, [#allocation3]  }
  0x13   :  { %s239_s9 = scalar_lea.hbm %s385_s3, 512 }
  0x14   :  { %p240_p8 = scmp.ne.s32.totalorder %s385_s3, %s239_s9  ;;  %p243_p9 = scmp.lt.u32.totalorder %s239_s9, %s385_s3 }
  0x16   :  { %p245_p10 = pnand %p243_p9, %p240_p8 }
  0x18   :  { %248 = shalt.err (!%p245_p10)
}
  0x19   :  { %s249_s14 = scalar_lea.vmem %s327_s21, 512  ;;  %p254_p12 = scmp.lt.s32.totalorder %s327_s21, %s327_s21 }
  0x1a   :  { %p250_p11 = scmp.ne.s32.totalorder %s327_s21, %s249_s14  ;;  %p255_p13 = scmp.lt.s32.totalorder %s249_s14, %s249_s14 }
  0x1c   :  { %p256_p0 = por %p255_p13, %p254_p12 }
  0x1e   :  { %p257_p1 = pnand %p256_p0, %p250_p11 }
  0x20   :  { %260 = shalt.err (!%p257_p1)
}
  0x21   :  { %s291_s0 = smov 128   ;;  %s292_s15 = smov 8  }
  0x22   :  { %38 = dma.hbm_to_vmem [thread:$0]  %s385_s3, 512, %s327_s21, [#allocation6], %s291_s0, %s291_s0, %s292_s15  }
  0x23   :  { %283 = dma.done.wait [#allocation3], 128  }
  0x24   :  { %284 = vsyncadd [#allocation3], 4294967168 }
  0x25   :  { %285 = dma.done.wait [#allocation6], 512  }
  0x26   :  { %286 = vsyncadd [#allocation6], 4294966784  ;;  %vm50_vm0 = vcmask 261120   ;;  %v47_v0 = vld [vmem:[#allocation2] sm:$0xff]  ;;  %v79_v7 = vld [vmem:[#allocation5] sm:$0xff]  ;;  %v293_v10 = vmov 0.0|0.0  }
  0x27   :  { %v51_v1 = vsel %vm50_vm0, %v47_v0, 0.0  ;;  %v80_v8 = vld [vmem:[#allocation5 + $0x8] sm:$0xff]  ;;  %v81_v9 = vld [vmem:[#allocation5 + $0x10] sm:$0xff]  ;;  %201 = vmatprep.subr.bf16.mxu0 %v293_v10  ;;  %v82_v12 = vld [vmem:[#allocation5 + $0x18] sm:$0xff]  ;;  %vm294_vm1 = vmmov 0   ;;  %v295_v13 = vmov 0.0  }
  0x28   :  { %52 = vadd.xlane.f32.xlu0 %v51_v1  ;;  %v202_v11 = vpack.c.bf16 %v80_v8, %v79_v7  ;;  %198 = vmatprep.mubr.msk.f32.mxu0 %vm294_vm1, %v295_v13  ;;  %v205_v14 = vpack.c.bf16 %v82_v12, %v81_v9  ;;  %v181_v19 = vld [vmem:[%s383_s1] ss:$0 sm:$0xff]  ;;  %s296_s23 = smov [#allocation7]   ;;  %vm163_vm2 = vcmask 785408  }
  0x29   :  { %v182_v21 = vld [vmem:[%s384_s2] ss:$0 sm:$0xff]  ;;  %s171_s24 = sshll.u32 %s296_s23, 4  ;;  %s172_s24 = int_to_ptr.vmem [resolvable:$true] %s171_s24 }
  0x2a   :  { %203 = vmatpush3.bf16.msra.mxu0 %v202_v11  ;;  %v183_v24 = vld [vmem:[%s386_s4] ss:$0 sm:$0xff]  ;;  %s261_s1 = scalar_lea.vmem %s172_s24, 128  ;;  %p266_p3 = scmp.lt.s32.totalorder %s172_s24, %s172_s24 }
  0x2b   :  { %204 = vmatprep.subr.bf16.mxu0 %v293_v10  ;;  %p262_p2 = scmp.ne.s32.totalorder %s172_s24, %s261_s1  ;;  %p267_p4 = scmp.lt.s32.totalorder %s261_s1, %s261_s1 }
  0x2d   :  { %p268_p5 = por %p267_p4, %p266_p3 }
  0x2e   :  { %206 = vmatpush3.bf16.msra.mxu0 %v205_v14 }
  0x2f   :  { %p269_p6 = pnand %p268_p5, %p262_p2 }
  0xb5   :  { %v53_v2 = vpop.xlane.xlu0 %52 }
  0xb6   :  { %v55_v3 = vmul.f32 0.03125, %v53_v2 }
  0xb8   :  { %v56_v4 = vsub.f32 %v47_v0, %v55_v3 }
  0xba   :  { %v57_v5 = vmul.f32 %v56_v4, %v56_v4 }
  0xbc   :  { %v58_v6 = vsel %vm50_vm0, %v57_v5, 0.0 }
  0xbd   :  { %59 = vadd.xlane.f32.xlu0 %v58_v6 }
 0x14a   :  { %v60_v15 = vpop.xlane.xlu0 %59 }
 0x14b   :  { %v61_v16 = vmul.f32 0.03125, %v60_v15 }
 0x14d   :  { %v62_v17 = vadd.f32 1e-05, %v61_v16 }
 0x14f   :  { %215 = vrsqrt.f32 %v62_v17 }
 0x159   :  { %v216_v18 = vpop.eup %215 }
 0x15a   :  { %v64_v20 = vmul.f32 %v216_v18, %v56_v4 }
 0x15c   :  { %v71_v22 = vmul.f32 %v181_v19, %v64_v20 }
 0x15e   :  { %v78_v23 = vadd.f32 %v182_v21, %v71_v22 }
 0x160   :  { %199 = vmatmul.mubr.msk.f32.vlgmr.msra.gmra.mrb[0].mxu0 %vm50_vm0, %v78_v23 }
 0x233   :  { %v159_v25 = vpop.f32.mrb[0].mxu0 }
 0x234   :  { %v160_v26 = vadd.f32 %v183_v24, %v159_v25  ;;  %v200_v27 = vpop.f32.mrb[1].mxu0 }
 0x236   :  { %164 = vst.msk [vmem:[#allocation7] sm:$0xff] %vm163_vm2, %v160_v26 }
 0x237   :  { %272 = shalt.err (!%p269_p6)
}
 0x238   :  { %s273_s26 = scalar_lea.hbm %s387_s5, 128 }
 0x239   :  { %p274_p7 = scmp.ne.s32.totalorder %s387_s5, %s273_s26  ;;  %p277_p8 = scmp.lt.u32.totalorder %s273_s26, %s387_s5 }
 0x23b   :  { %p279_p9 = pnand %p277_p8, %p274_p7 }
 0x23d   :  { %282 = shalt.err (!%p279_p9)
}
 0x23e   :  { %174 = dma.vmem_to_hbm [thread:$0]  %s172_s24, 128, %s387_s5, [#allocation4]  }
 0x23f   :  { %287 = dma.done.wait [#allocation4], 128  }
 0x240   :  { %288 = vsyncadd [#allocation4], 4294967168 }
 0x241   :  { %178 = vsyncpa [#allocation3], 1 }
 0x242   :  { %179 = vsyncpa [#allocation6], 1 }
 0x243   :  { %180 = vsyncpa [#allocation4], 1 }

</bundles_post_ra>
